<compile_context>
chip_gen: v7x
topology: tpu7x:2x2x1
jax: 0.10.0
libtpu: 0.0.40
codegen_flags: <defaults>
</compile_context>

<pallas_src>
import jax
import jax.numpy as jnp
from jax.experimental import pallas as pl
from jax.experimental.pallas import tpu as pltpu

NEG_SLOPE = 0.01          # nn.LeakyReLU default
DEFAULT_TILE_B = 4096     # rows per grid step (multiple of 8)


def _round_up(v, m):
    return ((v + m - 1) // m) * m


def _fused_linear_leakyrelu_kernel(x_ref, b_ref, wx_ref, wb_ref, bias_ref, o_ref):
    # x_ref : (TB, start)        b_ref : (TB, num_batch)
    # wx_ref: (start, f_out)     wb_ref: (num_batch, f_out)
    # bias_ref: (1, f_out)       o_ref : (TB, f_out)
    y = jnp.dot(x_ref[...], wx_ref[...], preferred_element_type=jnp.float32)
    y = y + jnp.dot(b_ref[...], wb_ref[...], preferred_element_type=jnp.float32)
    y = y + bias_ref[...]
    y = jnp.where(y > 0, y, NEG_SLOPE * y)          # LeakyReLU (f32 on VPU)
    # TODO(synk): Dropout(p=0.1) is inference-mode identity; no RNG mask applied.
    o_ref[...] = y.astype(o_ref.dtype)


def _linear_leakyrelu_kernel(x_ref, wx_ref, bias_ref, o_ref):
    # num_batch == 0 path (no concat in the PyTorch forward either).
    y = jnp.dot(x_ref[...], wx_ref[...], preferred_element_type=jnp.float32)
    y = y + bias_ref[...]
    y = jnp.where(y > 0, y, NEG_SLOPE * y)
    o_ref[...] = y.astype(o_ref.dtype)


def linear_layers_classifier_forward(x, batch, weight, bias, *,
                                     tile_b=DEFAULT_TILE_B,
                                     matmul_dtype=None):
    """bias=True forward path.

    x      : (B, start)               float32
    batch  : (B, num_batch) or None
    weight : (end, start + num_batch)   (nn.Linear layout, NOT transposed)
    bias   : (end,)
    matmul_dtype: e.g. jnp.bfloat16 -> x/batch/weights cast in the wrapper so
                  HBM read bytes are actually halved on v6e/v7x; accumulation
                  stays f32 via preferred_element_type.
    """
    B, start = x.shape
    num_batch = 0 if batch is None else batch.shape[1]
    f_out = weight.shape[0]
    out_dtype = x.dtype

    # Parameter prep is O(f_in * f_out) -- tiny, independent of B.
    w_t = weight.T                                    # (f_in, f_out)
    bias2d = bias.reshape(1, f_out).astype(jnp.float32)

    if matmul_dtype is not None:
        x = x.astype(matmul_dtype)
        w_t = w_t.astype(matmul_dtype)
        if batch is not None and num_batch:
            batch = batch.astype(matmul_dtype)

    w_x = w_t[:start]                                 # (start, f_out)
    w_b = w_t[start:]                                 # (num_batch, f_out)

    # Tile the batch dimension.  Ensure >= 2 grid steps for moderate B so the
    # "parallel" axis shards across both v7x TensorCores (no-op on v5e/v6e).
    if B <= 8:
        tb = B
    else:
        tb = min(tile_b, max(8, _round_up(pl.cdiv(B, 2), 8)))
    grid = (pl.cdiv(B, tb),)

    rowblock = lambda i: (i, 0)   # activations/output: tiled over B
    resident = lambda i: (0, 0)   # weights/bias: same (VMEM-resident) block each step
    compiler_params = pltpu.CompilerParams(dimension_semantics=("parallel",))

    if num_batch != 0:
        out = pl.pallas_call(
            _fused_linear_leakyrelu_kernel,
            out_shape=jax.ShapeDtypeStruct((B, f_out), out_dtype),
            grid=grid,
            in_specs=[
                pl.BlockSpec((tb, start), rowblock),
                pl.BlockSpec((tb, num_batch), rowblock),
                pl.BlockSpec((start, f_out), resident),
                pl.BlockSpec((num_batch, f_out), resident),
                pl.BlockSpec((1, f_out), resident),
            ],
            out_specs=pl.BlockSpec((tb, f_out), rowblock),
            compiler_params=compiler_params,
        )(x, batch, w_x, w_b, bias2d)
    else:
        out = pl.pallas_call(
            _linear_leakyrelu_kernel,
            out_shape=jax.ShapeDtypeStruct((B, f_out), out_dtype),
            grid=grid,
            in_specs=[
                pl.BlockSpec((tb, start), rowblock),
                pl.BlockSpec((start, f_out), resident),
                pl.BlockSpec((1, f_out), resident),
            ],
            out_specs=pl.BlockSpec((tb, f_out), rowblock),
            compiler_params=compiler_params,
        )(x, w_x, bias2d)

    return out


def _reference(x, batch, weight, bias):
    if batch is not None and batch.shape[1]:
        h = jnp.concatenate([x, batch], axis=1)
    else:
        h = x
    y = h @ weight.T + bias
    return jnp.where(y > 0, y, NEG_SLOPE * y)


if __name__ == "__main__":
    # Module hyper-params (consistent with __init__): start, end, num_batch
    start, num_batch, end = 28, 4, 16
    f_in = start + num_batch

    key = jax.random.PRNGKey(0)
    k_x, k_b, k_w, k_bias = jax.random.split(key, 4)

    bound = 1.0 / jnp.sqrt(jnp.float32(f_in))
    weight = jax.random.uniform(k_w, (end, f_in), dtype=jnp.float32,
                                minval=-bound, maxval=bound)
    bias = jax.random.uniform(k_bias, (end,), dtype=jnp.float32,
                              minval=-bound, maxval=bound)

    # Small single-block case (B <= 8 -> one grid step).
    B = 8
    x = jax.random.normal(k_x, (B, start), dtype=jnp.float32)
    batch = jax.random.normal(k_b, (B, num_batch), dtype=jnp.float32)

    out = linear_layers_classifier_forward(x, batch, weight, bias)
    jax.block_until_ready(out)
    ref = _reference(x, batch, weight, bias)
    assert out.shape == ref.shape
    assert jnp.allclose(out, ref, atol=1e-5, rtol=1e-5), "mismatch vs reference (small B)"

    # Tiled / multi-grid-step case (>= 2 steps -> exercises the parallel B-grid).
    B2 = 1024
    x2 = jax.random.normal(k_x, (B2, start), dtype=jnp.float32)
    batch2 = jax.random.normal(k_b, (B2, num_batch), dtype=jnp.float32)
    out2 = linear_layers_classifier_forward(x2, batch2, weight, bias)
    jax.block_until_ready(out2)
    ref2 = _reference(x2, batch2, weight, bias)
    assert jnp.allclose(out2, ref2, atol=1e-5, rtol=1e-5), "mismatch vs reference (tiled B)"

    # num_batch == 0 path (forward skips the concat entirely).
    weight0 = jax.random.uniform(k_w, (end, start), dtype=jnp.float32,
                                 minval=-bound, maxval=bound)
    out3 = linear_layers_classifier_forward(x2, None, weight0, bias)
    jax.block_until_ready(out3)
    ref3 = _reference(x2, None, weight0, bias)
    assert jnp.allclose(out3, ref3, atol=1e-5, rtol=1e-5), "mismatch vs reference (no batch)"

    print("KERNEL_OK")
</pallas_src>

<mosaic_0001>
module attributes {stable_mosaic.version = 11 : i64} {
  func.func @_fused_linear_leakyrelu_kernel(%arg0: i32, %arg1: memref<8x28xf32, #tpu.memory_space<vmem>>, %arg2: memref<8x4xf32, #tpu.memory_space<vmem>>, %arg3: memref<28x16xf32, #tpu.memory_space<vmem>>, %arg4: memref<4x16xf32, #tpu.memory_space<vmem>>, %arg5: memref<1x16xf32, #tpu.memory_space<vmem>>, %arg6: memref<8x16xf32, #tpu.memory_space<vmem>>) attributes {dimension_semantics = [#tpu.dimension_semantics<parallel>], iteration_bounds = array<i64: 1>, scalar_prefetch = 0 : i64, scratch_operands = 0 : i64, tpu.core_type = #tpu.core_type<tc>, window_params = [{transform_indices = @transform_0, window_bounds = array<i64: 8, 28>}, {transform_indices = @transform_1, window_bounds = array<i64: 8, 4>}, {pipeline_mode = #tpu.pipeline_mode<synchronous>, transform_indices = @transform_2, window_bounds = array<i64: 28, 16>}, {pipeline_mode = #tpu.pipeline_mode<synchronous>, transform_indices = @transform_3, window_bounds = array<i64: 4, 16>}, {pipeline_mode = #tpu.pipeline_mode<synchronous>, transform_indices = @transform_4, window_bounds = array<i64: 1, 16>}, {transform_indices = @transform_5, window_bounds = array<i64: 8, 16>}]} {
    %c0 = arith.constant 0 : index
    %c0_0 = arith.constant 0 : index
    %0 = vector.load %arg1[%c0, %c0_0] : memref<8x28xf32, #tpu.memory_space<vmem>>, vector<8x28xf32>
    %c0_1 = arith.constant 0 : index
    %c0_2 = arith.constant 0 : index
    %1 = vector.load %arg3[%c0_1, %c0_2] : memref<28x16xf32, #tpu.memory_space<vmem>>, vector<28x16xf32>
    %cst = arith.constant dense<0.000000e+00> : vector<8x16xf32>
    %2 = tpu.matmul %0, %1, %cst {dimension_numbers = #tpu.dot_dimension_numbers<[1], [0], [0], [1], [0, 0, 1, 1], [], []>} : vector<8x28xf32>, vector<28x16xf32>, vector<8x16xf32> -> vector<8x16xf32>
    %c0_3 = arith.constant 0 : index
    %c0_4 = arith.constant 0 : index
    %3 = vector.load %arg2[%c0_3, %c0_4] : memref<8x4xf32, #tpu.memory_space<vmem>>, vector<8x4xf32>
    %c0_5 = arith.constant 0 : index
    %c0_6 = arith.constant 0 : index
    %4 = vector.load %arg4[%c0_5, %c0_6] : memref<4x16xf32, #tpu.memory_space<vmem>>, vector<4x16xf32>
    %cst_7 = arith.constant dense<0.000000e+00> : vector<8x16xf32>
    %5 = tpu.matmul %3, %4, %cst_7 {dimension_numbers = #tpu.dot_dimension_numbers<[1], [0], [0], [1], [0, 0, 1, 1], [], []>} : vector<8x4xf32>, vector<4x16xf32>, vector<8x16xf32> -> vector<8x16xf32>
    %6 = arith.addf %2, %5 : vector<8x16xf32>
    %c0_8 = arith.constant 0 : index
    %c0_9 = arith.constant 0 : index
    %7 = vector.load %arg5[%c0_8, %c0_9] : memref<1x16xf32, #tpu.memory_space<vmem>>, vector<1x16xf32>
    %8 = vector.broadcast %7 : vector<1x16xf32> to vector<8x16xf32>
    %9 = arith.addf %6, %8 : vector<8x16xf32>
    %cst_10 = arith.constant 0.000000e+00 : f32
    %10 = vector.broadcast %cst_10 : f32 to vector<8x16xf32>
    %11 = arith.cmpf ogt, %9, %10 : vector<8x16xf32>
    %cst_11 = arith.constant 0.00999999977 : f32
    %12 = vector.broadcast %cst_11 : f32 to vector<8x16xf32>
    %13 = arith.mulf %12, %9 : vector<8x16xf32>
    %14 = arith.select %11, %9, %13 : vector<8x16xi1>, vector<8x16xf32>
    %c0_12 = arith.constant 0 : index
    %c0_13 = arith.constant 0 : index
    %15 = vector.load %arg6[%c0_12, %c0_13] : memref<8x16xf32, #tpu.memory_space<vmem>>, vector<8x16xf32>
    tpu.vector_store %arg6[%c0_12, %c0_13], %14 {strides = array<i32>} : memref<8x16xf32, #tpu.memory_space<vmem>>, vector<8x16xf32>,
    return
  }
  func.func @transform_0(%arg0: i32) -> (i32, i32) {
    %c0_i32 = arith.constant 0 : i32
    %c0_i32_0 = arith.constant 0 : i32
    return %arg0, %c0_i32 : i32, i32
  }
  func.func @transform_1(%arg0: i32) -> (i32, i32) {
    %c0_i32 = arith.constant 0 : i32
    %c0_i32_0 = arith.constant 0 : i32
    return %arg0, %c0_i32 : i32, i32
  }
  func.func @transform_2(%arg0: i32) -> (i32, i32) {
    %c0_i32 = arith.constant 0 : i32
    %c0_i32_0 = arith.constant 0 : i32
    %c0_i32_1 = arith.constant 0 : i32
    return %c0_i32, %c0_i32_0 : i32, i32
  }
  func.func @transform_3(%arg0: i32) -> (i32, i32) {
    %c0_i32 = arith.constant 0 : i32
    %c0_i32_0 = arith.constant 0 : i32
    %c0_i32_1 = arith.constant 0 : i32
    return %c0_i32, %c0_i32_0 : i32, i32
  }
  func.func @transform_4(%arg0: i32) -> (i32, i32) {
    %c0_i32 = arith.constant 0 : i32
    %c0_i32_0 = arith.constant 0 : i32
    %c0_i32_1 = arith.constant 0 : i32
    return %c0_i32, %c0_i32_0 : i32, i32
  }
  func.func @transform_5(%arg0: i32) -> (i32, i32) {
    %c0_i32 = arith.constant 0 : i32
    %c0_i32_0 = arith.constant 0 : i32
    return %arg0, %c0_i32 : i32, i32
  }
}

</mosaic_0001>

<bundles_post_ra>
// kernel: tpu_custom_call.1
= control target key start
LH: loop header
LB: loop body
LE: loop exit
PB: predicated region body
PF: predicated region fallthrough
CT: control target
= control target key end

     0   :  { %vm32_vm0 = vcmask 1043456   ;;  %v274_v3 = vmov 0.0|0.0   ;;  %v275_v5 = vmov 0.0   ;;  %vm276_vm1 = vmmov 0   ;;  %s347_s0 = inlined_call_operand.vmem [shape: f32[8,28], index: 0, kind: input, shape index: {}]   ;;  %s348_s1 = inlined_call_operand.vmem [shape: f32[8,4], index: 1, kind: input, shape index: {}]   ;;  %s349_s2 = inlined_call_operand.vmem [shape: f32[28,16], index: 2, kind: input, shape index: {}]   ;;  %s350_s3 = inlined_call_operand.vmem [shape: f32[4,16], index: 3, kind: input, shape index: {}]   ;;  %s351_s4 = inlined_call_operand.vmem [shape: f32[1,16], index: 4, kind: input, shape index: {}]   ;;  %s352_s5 = inlined_call_operand.hbm [shape: f32[8,16], index: 5, kind: output, shape index: {}]  }
   0x1   :  { %v22_v0 = vld [vmem:[%s349_s2] sm:$0xff]  ;;  %v23_v1 = vld [vmem:[%s349_s2 + $0x8] sm:$0xff]  ;;  %v24_v2 = vld [vmem:[%s349_s2 + $0x10] sm:$0xff]  ;;  %238 = vmatprep.subr.bf16.mxu1 %v274_v3  ;;  %222 = vmatprep.subr.mxu0 %v275_v5  ;;  %vm28_vm2 = vcmask 31744  }
   0x2   :  { %v239_v4 = vpack.c.bf16 %v23_v1, %v22_v0  ;;  %v25_v6 = vld [vmem:[%s349_s2 + $0x18] sm:$0xf]  ;;  %v27_v7 = vld [vmem:[%s350_s3] sm:$0xf]  ;;  %224 = vmatprep.mubr.msk.f32.mxu0 %vm276_vm1, %v275_v5 }
   0x3   :  { %223 = vmatpush3.msk.msra.mxu0 %vm32_vm0, %v27_v7  ;;  %v26_v8 = vld [vmem:[%s348_s1] sm:$0xff]  ;;  %v242_v9 = vpack.c.bf16 %v25_v6, %v24_v2 }
   0x4   :  { %240 = vmatpush3.bf16.msra.mxu1 %v239_v4  ;;  %225 = vmatmul.mubr.msk.f32.vlgmr.msra.gmra.mrb[0].mxu0 %vm28_vm2, %v26_v8 }
   0x5   :  { %10 = vsyncpa [#allocation3], 0  ;;  %241 = vmatprep.subr.bf16.mxu1 %v274_v3  ;;  %vm277_vm3 = vmmov 1   ;;  %235 = vmatprep.mubr.msk.f32.mxu1 %vm276_vm1, %v275_v5  ;;  %v21_v10 = vld [vmem:[%s347_s0] sm:$0xff]  ;;  %vm106_vm5 = vcmask 228352   ;;  %s278_s6 = smov [#allocation2]  }
   0x6   :  { %vm243_vm4 = vmpackc.low %vm32_vm0, %vm277_vm3  ;;  %v214_v14 = vld [vmem:[%s351_s4] ss:$0 sm:$0xff]  ;;  %s202_s7 = sshll.u32 %s278_s6, 4  ;;  %vm194_vm7 = vcmask 130048   ;;  %s203_s7 = int_to_ptr.vmem [resolvable:$true] %s202_s7 }
   0x7   :  { %s250_s0 = scalar_lea.vmem %s203_s7, 128  ;;  %p255_p1 = scmp.lt.s32.totalorder %s203_s7, %s203_s7 }
   0x8   :  { %244 = vmatpush3.bf16.msk.msra.mxu1 %vm243_vm4, %v242_v9  ;;  %p251_p0 = scmp.ne.s32.totalorder %s203_s7, %s250_s0  ;;  %p256_p2 = scmp.lt.s32.totalorder %s250_s0, %s250_s0 }
   0xa   :  { %p257_p3 = por %p256_p2, %p255_p1 }
   0xb   :  { %236 = vmatmul.mubr.msk.f32.vlgmr.msra.gmra.mrb[0].mxu1 %vm106_vm5, %v21_v10 }
   0xc   :  { %p258_p4 = pnand %p257_p3, %p251_p0 }
  0xd7   :  { %v102_v11 = vpop.f32.mrb[0].mxu0 }
  0xd8   :  { %v226_v12 = vpop.f32.mrb[1].mxu0 }
  0xde   :  { %v179_v13 = vpop.f32.mrb[0].mxu1 }
  0xdf   :  { %v180_v15 = vadd.f32 %v179_v13, %v102_v11  ;;  %v237_v16 = vpop.f32.mrb[1].mxu1 }
  0xe1   :  { %v190_v17 = vadd.f32 %v214_v14, %v180_v15 }
  0xe3   :  { %v192_v18 = vmul.f32 0.01, %v190_v17  ;;  %vm191_vm6 = vcmp.gt.f32.partialorder %v190_v17, 0.0 }
  0xe5   :  { %v193_v19 = vsel %vm191_vm6, %v190_v17, %v192_v18 }
  0xe6   :  { %195 = vst.msk [vmem:[#allocation2] sm:$0xff] %vm194_vm7, %v193_v19 }
  0xe7   :  { %261 = shalt.err (!%p258_p4)
}
  0xe8   :  { %s262_s9 = scalar_lea.hbm %s352_s5, 128 }
  0xe9   :  { %p263_p5 = scmp.ne.s32.totalorder %s352_s5, %s262_s9  ;;  %p266_p6 = scmp.lt.u32.totalorder %s262_s9, %s352_s5 }
  0xeb   :  { %p268_p7 = pnand %p266_p6, %p263_p5 }
  0xed   :  { %271 = shalt.err (!%p268_p7)
}
  0xee   :  { %205 = dma.vmem_to_hbm [thread:$0]  %s203_s7, 128, %s352_s5, [#allocation3]  }
  0xef   :  { %272 = dma.done.wait [#allocation3], 128  }
  0xf0   :  { %273 = vsyncadd [#allocation3], 4294967168 }
  0xf1   :  { %209 = vsyncpa [#allocation3], 1 }

</bundles_post_ra>
